<compile_context>
chip_gen: v7x
topology: tpu7x:2x2x1
jax: 0.10.0
libtpu: 0.0.40
codegen_flags: <defaults>
</compile_context>

<pallas_src>
import functools

import jax
import jax.numpy as jnp
from jax.experimental import pallas as pl
from jax.experimental.pallas import tpu as pltpu

# ---- config (mirrors args.*) ----
ATT_HEAD = 4
LATDIM = 32
DH = LATDIM // ATT_HEAD
HYPER_NUM = 16
N_NODES = 64
LEAKY = 0.5


# --------------------------------------------------------------------------------------
# Kernel: one grid step = one group of `gs` graphs stacked along the lane axis.
# --------------------------------------------------------------------------------------
def hgt_group_kernel(data_ref, pw_ref, wbd_ref, out_ref, *, gs, latdim, m, n, leaky):
    """
    data_ref : bf16 [2N + 3L + GM, L]  packed per-group slab (single DMA):
        rows [0, N)            Vs_nm [N, L]   Vs_nm[n, g*latdim+h*Dh+j] = value_g[h, j, n]
        rows [N, 2N)           Ks_nm [N, L]   Ks_nm[n, g*latdim+h*Dh+d] = key_g[h, n, d]
        rows [2N, 2N+L)        V_bd  [L, L]   block-diag(V_g)
        rows [2N+L, 2N+2L)     Ks_dm [L, N]   (lanes [0,N))   Ks_dm[g*latdim+h*Dh+d, n] = key_g[h,n,d]
        rows [2N+2L, 2N+3L)    HsT   [L, GM]  (lanes [0,GM))  block-structured hyper^T
        rows [2N+3L, 2N+3L+GM) Hs    [GM, L]                  block-structured hyper
    pw_ref   : f32 [L + 2*GM, L]:
        rows [0, L)        graph+head Dh-block-diagonal mask
        rows [L, L+GM)     lane 0 = b1 (tiled per graph)
        rows [L+GM, L+2GM) lane 0 = b2 (tiled per graph)
    wbd_ref  : bf16 [GM, >=2*GM]  lanes [0,GM)=block-diag(w1), [GM,2GM)=block-diag(w2)
    out_ref  : f32 [N, L]         out[n, g*latdim+c] = newLat_g[n, c]
    """
    L = gs * latdim
    GM = gs * m
    f32 = jnp.float32
    bf16 = jnp.bfloat16

    r_vnm = 0
    r_knm = r_vnm + n
    r_vbd = r_knm + n
    r_kdm = r_vbd + L
    r_hst = r_kdm + L
    r_hs = r_hst + L

    vs_nm = data_ref[r_vnm:r_knm, 0:L]            # [N, L]  bf16
    ks_nm = data_ref[r_knm:r_vbd, 0:L]            # [N, L]
    v_bd = data_ref[r_vbd:r_kdm, 0:L]             # [L, L]
    ks_dm = data_ref[r_kdm:r_hst, 0:n]            # [L, N]
    hs_t = data_ref[r_hst:r_hs, 0:GM]             # [L, GM]
    hs = data_ref[r_hs:r_hs + GM, 0:L]            # [GM, L]

    mask = pw_ref[0:L, 0:L]                       # [L, L]  f32
    b1 = pw_ref[L:L + GM, 0:1]                    # [GM, 1] f32
    b2 = pw_ref[L + GM:L + 2 * GM, 0:1]           # [GM, 1] f32
    w1_bd = wbd_ref[:, 0:GM]                      # [GM, GM] bf16
    w2_bd = wbd_ref[:, GM:2 * GM]                 # [GM, GM] bf16

    # stage 1: per-graph, per-head temlat1 (carried transposed) via block-diag masking
    G = jnp.dot(ks_dm, vs_nm, preferred_element_type=f32)             # [L, L]
    BD = G * mask
    T1 = jnp.dot(hs, BD.astype(bf16), preferred_element_type=f32)     # [GM, L]

    # stage 2: hyper-edge MLP + residuals (weights act on the left of the transposed carry).
    # Off-diagonal graph blocks pick up bias garbage here; the final mask removes it.
    z1 = jnp.dot(w1_bd, T1.astype(bf16), preferred_element_type=f32) + b1
    T2 = jnp.where(z1 > 0, z1, leaky * z1) + T1
    z2 = jnp.dot(w2_bd, T2.astype(bf16), preferred_element_type=f32) + b2
    T3 = jnp.where(z2 > 0, z2, leaky * z2) + T2                       # [GM, L]

    # stage 3: project back to nodes (all head/graph loops fused, lane-dense output)
    P = jnp.dot(T3.astype(bf16), v_bd, preferred_element_type=f32)    # [GM, L]
    Q = jnp.dot(hs_t, P.astype(bf16), preferred_element_type=f32)     # [L, L]
    Qbd = Q * mask
    out_ref[...] = jnp.dot(ks_nm, Qbd.astype(bf16), preferred_element_type=f32)


# --------------------------------------------------------------------------------------
# Packing helpers
# --------------------------------------------------------------------------------------
def _pad_lanes(x, width):
    pad = width - x.shape[-1]
    if pad == 0:
        return x
    cfg = [(0, 0)] * (x.ndim - 1) + [(0, pad)]
    return jnp.pad(x, cfg)


def make_layer_params(w1, b1, w2, b2, *, att_head, latdim, group_size):
    """Pack per-layer parameters ONCE (hoisted out of the per-call path)."""
    m = w1.shape[0]
    dh = latdim // att_head
    gs = group_size
    L = gs * latdim
    GM = gs * m
    f32 = jnp.float32

    # graph+head block-diagonal mask: Dh x Dh diagonal blocks over the stacked lat axis
    blk = jnp.arange(L) // dh
    mask = (blk[:, None] == blk[None, :]).astype(f32)                 # [L, L]

    b1c = jnp.tile(b1.reshape(-1).astype(f32), gs)[:, None]           # [GM, 1]
    b2c = jnp.tile(b2.reshape(-1).astype(f32), gs)[:, None]
    pslab = jnp.concatenate(
        [_pad_lanes(mask, L), _pad_lanes(b1c, L), _pad_lanes(b2c, L)], axis=0)  # f32 [L+2GM, L]

    eye = jnp.eye(gs, dtype=f32)
    w_bd = jnp.concatenate([jnp.kron(eye, w1.astype(f32)),
                            jnp.kron(eye, w2.astype(f32))], axis=1)   # [GM, 2GM]
    ww = -(-(2 * GM) // 128) * 128
    wslab = _pad_lanes(w_bd, ww).astype(jnp.bfloat16)
    return pslab, wslab


def _pack_group_slab(key, value, hyper, V, group_size):
    """Per-call layout glue: build one lane-dense bf16 slab per group of graphs."""
    B, H, N, Dh = key.shape
    latdim = H * Dh
    M = hyper.shape[1]
    gs = group_size
    L = gs * latdim
    GM = gs * M

    Bp = -(-B // gs) * gs
    if Bp != B:
        p = Bp - B
        key = jnp.concatenate([key, jnp.zeros((p,) + key.shape[1:], key.dtype)], 0)
        value = jnp.concatenate([value, jnp.zeros((p,) + value.shape[1:], value.dtype)], 0)
        hyper = jnp.concatenate([hyper, jnp.zeros((p,) + hyper.shape[1:], hyper.dtype)], 0)
        V = jnp.concatenate([V, jnp.zeros((p,) + V.shape[1:], V.dtype)], 0)
    Gr = Bp // gs

    k_nm = jnp.transpose(key, (0, 2, 1, 3)).reshape(Bp, N, latdim)    # [B, N, latdim]
    v_nm = jnp.transpose(value, (0, 3, 1, 2)).reshape(Bp, N, latdim)  # [B, N, latdim]
    k_dm = jnp.transpose(key, (0, 1, 3, 2)).reshape(Bp, latdim, N)    # [B, latdim, N]

    def lane_stack(x):  # [Bp, N, latdim] -> [Gr, N, gs*latdim]
        return jnp.transpose(x.reshape(Gr, gs, N, latdim), (0, 2, 1, 3)).reshape(Gr, N, L)

    Ks_nm = lane_stack(k_nm)
    Vs_nm = lane_stack(v_nm)
    Ks_dm = k_dm.reshape(Gr, L, N)

    eye = jnp.eye(gs, dtype=key.dtype)
    Hs = jnp.einsum("bgmd,gh->bgmhd",
                    hyper.reshape(Gr, gs, M, latdim), eye).reshape(Gr, GM, L)
    HsT = jnp.swapaxes(Hs, 1, 2)                                      # [Gr, L, GM]
    V_bd = jnp.einsum("bgij,gh->bgihj",
                      V.reshape(Gr, gs, latdim, latdim), eye).reshape(Gr, L, L)

    slab = jnp.concatenate(
        [_pad_lanes(Vs_nm, L), _pad_lanes(Ks_nm, L), _pad_lanes(V_bd, L),
         _pad_lanes(Ks_dm, L), _pad_lanes(HsT, L), _pad_lanes(Hs, L)],
        axis=1).astype(jnp.bfloat16)                                  # [Gr, 2N+3L+GM, L]
    R = slab.shape[1]
    return slab.reshape(Gr * R, L), Gr, R, Bp


# --------------------------------------------------------------------------------------
# Batched forward (B independent graphs, one pallas_call, parallel grid)
# --------------------------------------------------------------------------------------
@functools.partial(jax.jit, static_argnames=("att_head", "leaky", "group_size"))
def hypergraph_transformer_forward_batched(key, value, hyper, V, pslab, wslab, *,
                                           att_head, leaky, group_size):
    B, H, N, Dh = key.shape
    assert H == att_head
    latdim = H * Dh
    M = hyper.shape[1]
    gs = group_size
    L = gs * latdim
    GM = gs * M
    assert L % 128 == 0, "stacked lat dim must be lane-dense (multiple of 128)"
    assert N % 8 == 0 and GM % 8 == 0

    f32 = jnp.float32
    slab, Gr, R, Bp = _pack_group_slab(key.astype(f32), value.astype(f32),
                                       hyper.astype(f32), V.astype(f32), gs)

    kernel = functools.partial(hgt_group_kernel, gs=gs, latdim=latdim, m=M, n=N,
                               leaky=float(leaky))

    per_group_flops = 2 * (L * N * L + GM * L * L + 2 * GM * GM * L
                           + GM * L * L + L * GM * L + N * L * L)
    bytes_accessed = slab.size * 2 + pslab.size * 4 + wslab.size * 2 + Gr * N * L * 4

    out = pl.pallas_call(
        kernel,
        out_shape=jax.ShapeDtypeStruct((Gr * N, L), f32),
        grid=(Gr,),
        in_specs=[
            pl.BlockSpec((R, L), lambda i: (i, 0)),              # per-group data slab
            pl.BlockSpec(pslab.shape, lambda i: (0, 0)),         # mask + biases (fetched once)
            pl.BlockSpec(wslab.shape, lambda i: (0, 0)),         # block-diag W1|W2 (fetched once)
        ],
        out_specs=pl.BlockSpec((N, L), lambda i: (i, 0)),        # lane-dense [N, 128] output
        compiler_params=pltpu.CompilerParams(dimension_semantics=("parallel",)),
        cost_estimate=pl.CostEstimate(flops=int(Gr * per_group_flops), transcendentals=0,
                                      bytes_accessed=int(bytes_accessed)),
    )(slab, pslab, wslab)

    out = out.reshape(Gr, N, gs, latdim)
    out = jnp.transpose(out, (0, 2, 1, 3)).reshape(Bp, N, latdim)
    return out[:B]


def hypergraph_transformer_layer(lats, key, value, hyper, V, pslab, wslab, *,
                                 att_head=ATT_HEAD, leaky=LEAKY, group_size=None):
    """Module-style interface (one graph per call), implemented on the batched kernel."""
    latdim = key.shape[0] * key.shape[2]
    if group_size is None:
        group_size = max(1, 128 // latdim)
    new_lat = hypergraph_transformer_forward_batched(
        key[None], value[None], hyper[None], V[None], pslab, wslab,
        att_head=att_head, leaky=leaky, group_size=group_size)[0]
    return lats + [new_lat]


# --------------------------------------------------------------------------------------
# Pure-JAX reference (transcription of the PyTorch forward) and self-test
# --------------------------------------------------------------------------------------
def reference(key, value, hyper, V, w1, b1, w2, b2, leaky, att_head, latdim):
    dh = latdim // att_head
    lr = lambda x: jnp.where(x > 0, x, leaky * x)
    temlat1 = value @ key                                              # [H, Dh, Dh]
    hyp = jnp.transpose(hyper.reshape(-1, att_head, dh), (1, 2, 0))    # [H, Dh, M]
    temlat1 = jnp.reshape(temlat1 @ hyp, (latdim, -1))                 # [latdim, M]
    temlat2 = lr(temlat1 @ w1.T + b1) + temlat1
    temlat3 = lr(temlat2 @ w2.T + b2) + temlat2
    pre = jnp.reshape(temlat3.T @ V, (-1, att_head, dh))               # [M, H, Dh]
    pre = jnp.transpose(pre, (1, 0, 2))                                # [H, M, Dh]
    pre = hyp @ pre                                                    # [H, Dh, Dh]
    new_lat = key @ pre                                                # [H, N, Dh]
    return jnp.reshape(jnp.transpose(new_lat, (1, 0, 2)), (-1, latdim))


if __name__ == "__main__":
    B = 8                                    # batch of independent graphs
    GS = 128 // LATDIM                       # graphs per grid step (lane-dense 128)

    root = jax.random.PRNGKey(0)
    ks = jax.random.split(root, 8)

    key_in = jax.random.normal(ks[0], (B, ATT_HEAD, N_NODES, DH), jnp.float32) * 0.5
    value_in = jax.random.normal(ks[1], (B, ATT_HEAD, DH, N_NODES), jnp.float32) * 0.5
    hyper_in = jax.random.normal(ks[2], (B, HYPER_NUM, LATDIM), jnp.float32) * 0.5
    V_in = jax.random.normal(ks[3], (B, LATDIM, LATDIM), jnp.float32) * 0.1

    scale = 1.0 / (HYPER_NUM ** 0.5)
    w1 = jax.random.uniform(ks[4], (HYPER_NUM, HYPER_NUM), jnp.float32, -scale, scale)
    b1 = jax.random.uniform(ks[5], (HYPER_NUM,), jnp.float32, -scale, scale)
    w2 = jax.random.uniform(ks[6], (HYPER_NUM, HYPER_NUM), jnp.float32, -scale, scale)
    b2 = jax.random.uniform(ks[7], (HYPER_NUM,), jnp.float32, -scale, scale)

    # hoisted per-layer parameter packing (done once, reused across calls)
    pslab, wslab = make_layer_params(w1, b1, w2, b2, att_head=ATT_HEAD, latdim=LATDIM,
                                     group_size=GS)

    out = hypergraph_transformer_forward_batched(
        key_in, value_in, hyper_in, V_in, pslab, wslab,
        att_head=ATT_HEAD, leaky=LEAKY, group_size=GS)
    out = jax.block_until_ready(out)
    assert out.shape == (B, N_NODES, LATDIM), out.shape

    ref = jax.vmap(lambda k, v, h, Vm: reference(k, v, h, Vm, w1, b1, w2, b2,
                                                 LEAKY, ATT_HEAD, LATDIM))(
        key_in, value_in, hyper_in, V_in)
    rel = float(jnp.linalg.norm(out - ref) / (jnp.linalg.norm(ref) + 1e-6))
    if rel > 3e-2:   # bf16 operands / f32 accumulation
        raise AssertionError(f"batched Pallas output mismatch (rel fro err {rel})")

    # module-style single-graph interface (pads the group with zero graphs internally)
    lats = hypergraph_transformer_layer([], key_in[0], value_in[0], hyper_in[0], V_in[0],
                                        pslab, wslab, att_head=ATT_HEAD, leaky=LEAKY,
                                        group_size=GS)
    single = jax.block_until_ready(lats[-1])
    rel1 = float(jnp.linalg.norm(single - ref[0]) / (jnp.linalg.norm(ref[0]) + 1e-6))
    if rel1 > 3e-2:
        raise AssertionError(f"single-graph Pallas output mismatch (rel fro err {rel1})")

    print("KERNEL_OK")
</pallas_src>

<mosaic_0001>
module attributes {stable_mosaic.version = 11 : i64} {
  func.func @hgt_group_kernel(%arg0: i32, %arg1: memref<576x128xbf16, #tpu.memory_space<vmem>>, %arg2: memref<256x128xf32, #tpu.memory_space<vmem>>, %arg3: memref<64x128xbf16, #tpu.memory_space<vmem>>, %arg4: memref<64x128xf32, #tpu.memory_space<vmem>>) attributes {dimension_semantics = [#tpu.dimension_semantics<parallel>], iteration_bounds = array<i64: 2>, scalar_prefetch = 0 : i64, scratch_operands = 0 : i64, tpu.core_type = #tpu.core_type<tc>, window_params = [{transform_indices = @transform_0, window_bounds = array<i64: 576, 128>}, {pipeline_mode = #tpu.pipeline_mode<synchronous>, transform_indices = @transform_1, window_bounds = array<i64: 256, 128>}, {pipeline_mode = #tpu.pipeline_mode<synchronous>, transform_indices = @transform_2, window_bounds = array<i64: 64, 128>}, {transform_indices = @transform_3, window_bounds = array<i64: 64, 128>}]} {
    %c0 = arith.constant 0 : index
    %c0_0 = arith.constant 0 : index
    %0 = vector.load %arg1[%c0, %c0_0] : memref<576x128xbf16, #tpu.memory_space<vmem>>, vector<64x128xbf16>
    %c64 = arith.constant 64 : index
    %c0_1 = arith.constant 0 : index
    %1 = vector.load %arg1[%c64, %c0_1] : memref<576x128xbf16, #tpu.memory_space<vmem>>, vector<64x128xbf16>
    %c128 = arith.constant 128 : index
    %c0_2 = arith.constant 0 : index
    %2 = vector.load %arg1[%c128, %c0_2] : memref<576x128xbf16, #tpu.memory_space<vmem>>, vector<128x128xbf16>
    %c256 = arith.constant 256 : index
    %c0_3 = arith.constant 0 : index
    %3 = vector.load %arg1[%c256, %c0_3] : memref<576x128xbf16, #tpu.memory_space<vmem>>, vector<128x64xbf16>
    %c384 = arith.constant 384 : index
    %c0_4 = arith.constant 0 : index
    %4 = vector.load %arg1[%c384, %c0_4] : memref<576x128xbf16, #tpu.memory_space<vmem>>, vector<128x64xbf16>
    %c512 = arith.constant 512 : index
    %c0_5 = arith.constant 0 : index
    %5 = vector.load %arg1[%c512, %c0_5] : memref<576x128xbf16, #tpu.memory_space<vmem>>, vector<64x128xbf16>
    %c0_6 = arith.constant 0 : index
    %c0_7 = arith.constant 0 : index
    %6 = vector.load %arg2[%c0_6, %c0_7] : memref<256x128xf32, #tpu.memory_space<vmem>>, vector<128x128xf32>
    %c128_8 = arith.constant 128 : index
    %c0_9 = arith.constant 0 : index
    %7 = vector.load %arg2[%c128_8, %c0_9] : memref<256x128xf32, #tpu.memory_space<vmem>>, vector<64x1xf32>
    %c192 = arith.constant 192 : index
    %c0_10 = arith.constant 0 : index
    %8 = vector.load %arg2[%c192, %c0_10] : memref<256x128xf32, #tpu.memory_space<vmem>>, vector<64x1xf32>
    %c0_11 = arith.constant 0 : index
    %c0_12 = arith.constant 0 : index
    %9 = vector.load %arg3[%c0_11, %c0_12] : memref<64x128xbf16, #tpu.memory_space<vmem>>, vector<64x64xbf16>
    %c0_13 = arith.constant 0 : index
    %c64_14 = arith.constant 64 : index
    %10 = vector.load %arg3[%c0_13, %c64_14] : memref<64x128xbf16, #tpu.memory_space<vmem>>, vector<64x64xbf16>
    %cst = arith.constant dense<0.000000e+00> : vector<128x128xf32>
    %11 = tpu.matmul %3, %0, %cst {dimension_numbers = #tpu.dot_dimension_numbers<[1], [0], [0], [1], [0, 0, 1, 1], [], []>} : vector<128x64xbf16>, vector<64x128xbf16>, vector<128x128xf32> -> vector<128x128xf32>
    %12 = arith.mulf %11, %6 : vector<128x128xf32>
    %13 = arith.truncf %12 : vector<128x128xf32> to vector<128x128xbf16>
    %cst_15 = arith.constant dense<0.000000e+00> : vector<64x128xf32>
    %14 = tpu.matmul %5, %13, %cst_15 {dimension_numbers = #tpu.dot_dimension_numbers<[1], [0], [0], [1], [0, 0, 1, 1], [], []>} : vector<64x128xbf16>, vector<128x128xbf16>, vector<64x128xf32> -> vector<64x128xf32>
    %15 = arith.truncf %14 : vector<64x128xf32> to vector<64x128xbf16>
    %cst_16 = arith.constant dense<0.000000e+00> : vector<64x128xf32>
    %16 = tpu.matmul %9, %15, %cst_16 {dimension_numbers = #tpu.dot_dimension_numbers<[1], [0], [0], [1], [0, 0, 1, 1], [], []>} : vector<64x64xbf16>, vector<64x128xbf16>, vector<64x128xf32> -> vector<64x128xf32>
    %17 = vector.broadcast %7 : vector<64x1xf32> to vector<64x128xf32>
    %18 = arith.addf %16, %17 : vector<64x128xf32>
    %cst_17 = arith.constant 0.000000e+00 : f32
    %19 = vector.broadcast %cst_17 : f32 to vector<64x128xf32>
    %20 = arith.cmpf ogt, %18, %19 : vector<64x128xf32>
    %cst_18 = arith.constant 5.000000e-01 : f32
    %21 = vector.broadcast %cst_18 : f32 to vector<64x128xf32>
    %22 = arith.mulf %21, %18 : vector<64x128xf32>
    %23 = arith.select %20, %18, %22 : vector<64x128xi1>, vector<64x128xf32>
    %24 = arith.addf %23, %14 : vector<64x128xf32>
    %25 = arith.truncf %24 : vector<64x128xf32> to vector<64x128xbf16>
    %cst_19 = arith.constant dense<0.000000e+00> : vector<64x128xf32>
    %26 = tpu.matmul %10, %25, %cst_19 {dimension_numbers = #tpu.dot_dimension_numbers<[1], [0], [0], [1], [0, 0, 1, 1], [], []>} : vector<64x64xbf16>, vector<64x128xbf16>, vector<64x128xf32> -> vector<64x128xf32>
    %27 = vector.broadcast %8 : vector<64x1xf32> to vector<64x128xf32>
    %28 = arith.addf %26, %27 : vector<64x128xf32>
    %cst_20 = arith.constant 0.000000e+00 : f32
    %29 = vector.broadcast %cst_20 : f32 to vector<64x128xf32>
    %30 = arith.cmpf ogt, %28, %29 : vector<64x128xf32>
    %cst_21 = arith.constant 5.000000e-01 : f32
    %31 = vector.broadcast %cst_21 : f32 to vector<64x128xf32>
    %32 = arith.mulf %31, %28 : vector<64x128xf32>
    %33 = arith.select %30, %28, %32 : vector<64x128xi1>, vector<64x128xf32>
    %34 = arith.addf %33, %24 : vector<64x128xf32>
    %35 = arith.truncf %34 : vector<64x128xf32> to vector<64x128xbf16>
    %cst_22 = arith.constant dense<0.000000e+00> : vector<64x128xf32>
    %36 = tpu.matmul %35, %2, %cst_22 {dimension_numbers = #tpu.dot_dimension_numbers<[1], [0], [0], [1], [0, 0, 1, 1], [], []>} : vector<64x128xbf16>, vector<128x128xbf16>, vector<64x128xf32> -> vector<64x128xf32>
    %37 = arith.truncf %36 : vector<64x128xf32> to vector<64x128xbf16>
    %cst_23 = arith.constant dense<0.000000e+00> : vector<128x128xf32>
    %38 = tpu.matmul %4, %37, %cst_23 {dimension_numbers = #tpu.dot_dimension_numbers<[1], [0], [0], [1], [0, 0, 1, 1], [], []>} : vector<128x64xbf16>, vector<64x128xbf16>, vector<128x128xf32> -> vector<128x128xf32>
    %39 = arith.mulf %38, %6 : vector<128x128xf32>
    %40 = arith.truncf %39 : vector<128x128xf32> to vector<128x128xbf16>
    %cst_24 = arith.constant dense<0.000000e+00> : vector<64x128xf32>
    %41 = tpu.matmul %1, %40, %cst_24 {dimension_numbers = #tpu.dot_dimension_numbers<[1], [0], [0], [1], [0, 0, 1, 1], [], []>} : vector<64x128xbf16>, vector<128x128xbf16>, vector<64x128xf32> -> vector<64x128xf32>
    %c0_25 = arith.constant 0 : index
    %c0_26 = arith.constant 0 : index
    %42 = vector.load %arg4[%c0_25, %c0_26] : memref<64x128xf32, #tpu.memory_space<vmem>>, vector<64x128xf32>
    tpu.vector_store %arg4[%c0_25, %c0_26], %41 {strides = array<i32>} : memref<64x128xf32, #tpu.memory_space<vmem>>, vector<64x128xf32>,
    return
  }
  func.func @transform_0(%arg0: i32) -> (i32, i32) {
    %c0_i32 = arith.constant 0 : i32
    %c0_i32_0 = arith.constant 0 : i32
    return %arg0, %c0_i32 : i32, i32
  }
  func.func @transform_1(%arg0: i32) -> (i32, i32) {
    %c0_i32 = arith.constant 0 : i32
    %c0_i32_0 = arith.constant 0 : i32
    %c0_i32_1 = arith.constant 0 : i32
    return %c0_i32, %c0_i32_0 : i32, i32
  }
  func.func @transform_2(%arg0: i32) -> (i32, i32) {
    %c0_i32 = arith.constant 0 : i32
    %c0_i32_0 = arith.constant 0 : i32
    %c0_i32_1 = arith.constant 0 : i32
    return %c0_i32, %c0_i32_0 : i32, i32
  }
  func.func @transform_3(%arg0: i32) -> (i32, i32) {
    %c0_i32 = arith.constant 0 : i32
    %c0_i32_0 = arith.constant 0 : i32
    return %arg0, %c0_i32 : i32, i32
  }
}

</mosaic_0001>

<bundles_post_ra>
// kernel: hypergraph_transformer_forward_batched.1
= control target key start
LH: loop header
LB: loop body
LE: loop exit
PB: predicated region body
PF: predicated region fallthrough
CT: control target
= control target key end

     0   :  { %s1763_s12 = smov 0   ;;  %s2082_s0 = inlined_call_operand.vmem [shape: bf16[1152,128], index: 0, kind: input, shape index: {}]   ;;  %s2083_s1 = inlined_call_operand.vmem [shape: f32[256,128], index: 1, kind: input, shape index: {}]   ;;  %s2084_s2 = inlined_call_operand.vmem [shape: bf16[64,128], index: 2, kind: input, shape index: {}]   ;;  %s2085_s3 = inlined_call_operand.vmem [shape: f32[128,128], index: 3, kind: output, shape index: {}]  }
   0x1 LB: > { %s1379_s13 = sadd.s32 4294967295, %s1739_s12   ;;  %p1383_p0 = scmp.ge.s32.totalorder %s1739_s12, 1  ;;  %s1739_s12 = sphi %s1763_s12, %s13_s12  }
   0x2   : > { %p138_p1 = scmp.lt.s32.totalorder %s1739_s12, 3 }
   0x4   : > { %p139_p2 = pnand %p1383_p0, %p138_p1 }
   0x5   : > { %s162_s14 = smul.u32 (!%p139_p2), 72, %s1379_s13  ;;  %vm351_vm0 = vcmask (!%p139_p2), 523264   ;;  %v1802_v13 = vld [vmem:[%s2083_s1 + $0x10] sm:$0xff] (!%p139_p2)  ;;  %v1807_v15 = vld [vmem:[%s2083_s1 + $0x18] sm:$0xff] (!%p139_p2)  ;;  %v1812_v16 = vld [vmem:[%s2083_s1] sm:$0xff] (!%p139_p2)  ;;  %s1742_s23 = smov (!%p139_p2), 64  }
   0x6   : > { %142 = sbr.rel (%p139_p2) target bundleno = 1690 (0x69a), region = 32  ;;  %v1817_v18 = vld [vmem:[%s2083_s1 + $0x8] sm:$0xff] (!%p139_p2)  ;;  %v1826_v27 = vld [vmem:[%s2083_s1 + $0x30] sm:$0xff] (!%p139_p2)  ;;  %v1831_v29 = vld [vmem:[%s2083_s1 + $0x38] sm:$0xff] (!%p139_p2)  ;;  %s1385_s20 = sshll.u32 (!%p139_p2), %s1379_s13, 3 }
   0x7   : > { %p163_p3 = scmp.lt.s32.totalorder (!%p139_p2), %s162_s14, 143  ;;  %v1836_v30 = vld [vmem:[%s2083_s1 + $0x20] sm:$0xff] (!%p139_p2)  ;;  %v1841_v32 = vld [vmem:[%s2083_s1 + $0x28] sm:$0xff] (!%p139_p2)  ;;  %v1850_v41 = vld [vmem:[%s2083_s1 + $0x50] sm:$0xff] (!%p139_p2)  ;;  %p169_p4 = scmp.lt.s32.totalorder (!%p139_p2), %s1385_s20, 15 }
   0x8   : > { %v1855_v43 = vld [vmem:[%s2083_s1 + $0x58] sm:$0xff] (!%p139_p2)  ;;  %v1860_v44 = vld [vmem:[%s2083_s1 + $0x40] sm:$0xff] (!%p139_p2)  ;;  %v1865_v46 = vld [vmem:[%s2083_s1 + $0x48] sm:$0xff] (!%p139_p2) }
   0x9   : > { %v1874_v55 = vld [vmem:[%s2083_s1 + $0x70] sm:$0xff] (!%p139_p2)  ;;  %v1879_v57 = vld [vmem:[%s2083_s1 + $0x78] sm:$0xff] (!%p139_p2)  ;;  %v1884_v58 = vld [vmem:[%s2083_s1 + $0x60] sm:$0xff] (!%p139_p2) }
   0xa   : > { %v1889_v60 = vld [vmem:[%s2083_s1 + $0x68] sm:$0xff] (!%p139_p2) }
   0xd   : > { %s2087_s14 = smov (!%p163_p3, %s162_s14), 143  ;;  %s2089_s20 = smov (!%p169_p4, %s1385_s20), 15 }
   0xe   : > { %s1384_s15 = sshll.u32 %s2087_s14, 2  ;;  %s1386_s21 = sshll.u32 %s2089_s20, 3 }
   0xf   : > { %s1776_s18 = scalar_lea.vmem %s2082_s0, %s1384_s15  ;;  %s172_s24 = scalar_lea.vmem %s2085_s3, %s1386_s21 }
  0x10   : > { %v1693_v0 = vld [vmem:[%s1776_s18] sm:$0xff]   ;;  %v1694_v1 = vld [vmem:[%s1776_s18 + $0x8] sm:$0xff]   ;;  %v1695_v2 = vld [vmem:[%s1776_s18 + $0x10] sm:$0xff]  }
  0x11   : > { %1529 = vmatprep.subr.bf16.mxu0 %v1693_v0  ;;  %v1697_v3 = vld [vmem:[%s1776_s18 + $0x80] sm:$0xff]   ;;  %v1696_v4 = vld [vmem:[%s1776_s18 + $0x18] sm:$0xff]   ;;  %v1698_v5 = vld [vmem:[%s1776_s18 + $0x88] sm:$0xff]  }
  0x12   : > { %1530 = vmatpush3.bf16.msra.mxu0 %v1693_v0  ;;  %1537 = vmatprep.mubr.msk.bf16.mxu0 %vm351_vm0, %v1697_v3  ;;  %v1699_v6 = vld [vmem:[%s1776_s18 + $0x90] sm:$0xff]   ;;  %v1700_v7 = vld [vmem:[%s1776_s18 + $0x98] sm:$0xff]   ;;  %v1701_v8 = vld [vmem:[%s1776_s18 + $0xa0] sm:$0xff]  }
  0x13   : > { %1531 = vmatprep.subr.bf16.mxu0 %v1694_v1  ;;  %v1702_v9 = vld [vmem:[%s1776_s18 + $0xa8] sm:$0xff]   ;;  %v1703_v10 = vld [vmem:[%s1776_s18 + $0xb0] sm:$0xff]   ;;  %v1704_v11 = vld [vmem:[%s1776_s18 + $0xb8] sm:$0xff]  }
  0x14   : > { %v1705_v12 = vld [vmem:[%s1776_s18 + $0x100] sm:$0xff]  }
  0x15   : > { %1569 = vmatprep.mubr.bf16.mxu1 %v1705_v12  ;;  %v264_v12 = vld [vmem:[%s2083_s1 + $0x88] sm:$0xff] }
  0x16   : > { %1532 = vmatpush3.bf16.msra.mxu0 %v1694_v1 }
  0x17   : > { %1533 = vmatprep.subr.bf16.mxu0 %v1695_v2 }
  0x1a   : > { %1534 = vmatpush3.bf16.msra.mxu0 %v1695_v2 }
  0x1b   : > { %1535 = vmatprep.subr.bf16.mxu0 %v1696_v4 }
  0x1e   : > { %1536 = vmatpush3.bf16.msra.mxu0 %v1696_v4 }
  0x21   : > { %1538 = vmatmul.mubr.msk.bf16.vlgmr.msra.gmra.mrb[0].mxu0 %vm351_vm0, %v1698_v5  ;;  %v1706_v5 = vld [vmem:[%s1776_s18 + $0x108] sm:$0xff]  }
  0x22   : > { %1541 = vmatprep.mubr.msk.bf16.mxu0 %vm351_vm0, %v1699_v6  ;;  %v1707_v6 = vld [vmem:[%s1776_s18 + $0x110] sm:$0xff]  }
  0x29   : > { %1542 = vmatmul.mubr.msk.bf16.gmra.mrb[4].mxu0 %vm351_vm0, %v1700_v7  ;;  %v1708_v7 = vld [vmem:[%s1776_s18 + $0x118] sm:$0xff]  }
  0x2a   : > { %1545 = vmatprep.mubr.msk.bf16.mxu0 %vm351_vm0, %v1701_v8  ;;  %v1709_v8 = vld [vmem:[%s2084_s2] sm:$0xff]  }
  0x31   : > { %1546 = vmatmul.mubr.msk.bf16.gmra.mrb[8].mxu0 %vm351_vm0, %v1702_v9  ;;  %v263_v9 = vld [vmem:[%s2083_s1 + $0x80] sm:$0xff] }
  0x32   : > { %1549 = vmatprep.mubr.msk.bf16.mxu0 %vm351_vm0, %v1703_v10  ;;  %v265_v10 = vld [vmem:[%s2083_s1 + $0x90] sm:$0xff] }
  0x39   : > { %1550 = vmatmul.mubr.msk.bf16.gmra.mrb[12].mxu0 %vm351_vm0, %v1704_v11  ;;  %v1741_v11 = vmov 0  }
  0x3a   : > { %1585 = vmatprep.mubr.msk.bf16.mxu0 %vm351_vm0, %v1709_v8  ;;  %1691 = vset.pattern.permute.xlu0 %v1741_v11 }
  0x3b   : > { %1692 = vset.pattern.permute.xlu1 %v1741_v11  ;;  %592 = vperm.xlu0 %1691, %v263_v9  }
  0x3c   : > { %602 = vperm.xlu1 %1692, %v265_v10  }
  0x3f   : > { %597 = vperm.xlu0 %1691, %v264_v12  }
  0xf4   : > { %v1539_v14 = vpop.f32.mrb[0].mxu0 }
  0xf5   : > { %v410_v17 = vpop.f32.mrb[1].mxu0  ;;  %v475_v20 = vmul.f32 %v1539_v14, %v1802_v13  ;;  %v266_v14 = vld [vmem:[%s2083_s1 + $0x98] sm:$0xff] }
  0xf6   : > { %v1540_v19 = vpop.f32.mrb[2].mxu0  ;;  %v473_v23 = vmul.f32 %v410_v17, %v1812_v16  ;;  %607 = vperm.xlu1 %1692, %v266_v14   ;;  %v267_v17 = vld [vmem:[%s2083_s1 + $0xa0] sm:$0xff] }
  0xf7   : > { %v476_v21 = vmul.f32 %v1540_v19, %v1807_v15  ;;  %v413_v22 = vpop.f32.mrb[3].mxu0  ;;  %v268_v19 = vld [vmem:[%s2083_s1 + $0xa8] sm:$0xff]  ;;  %612 = vperm.xlu0 %1691, %v267_v17  }
  0xf8   : > { %v474_v24 = vmul.f32 %v413_v22, %v1817_v18  ;;  %v1710_v22 = vld [vmem:[%s2084_s2 + $0x8] sm:$0xff]  }
  0xf9   : > { %v490_v25 = vpack.c.bf16 %v476_v21, %v475_v20  ;;  %v269_v20 = vld [vmem:[%s2083_s1 + $0xb0] sm:$0xff]  ;;  %v270_v21 = vld [vmem:[%s2083_s1 + $0xb8] sm:$0xff] }
  0xfa   : > { %v489_v26 = vpack.c.bf16 %v474_v24, %v473_v23  ;;  %617 = vperm.xlu1 %1692, %v268_v19   ;;  %v1711_v23 = vld [vmem:[%s2084_s2 + $0x10] sm:$0xff]   ;;  %v1712_v24 = vld [vmem:[%s2084_s2 + $0x18] sm:$0xff]  }
  0xfb   : > { %622 = vperm.xlu0 %1691, %v269_v20  }
  0xfc   : > { %v1543_v28 = vpop.f32.mrb[4].mxu0  ;;  %1553 = vmatprep.subr.bf16.mxu1 %v489_v26 }
  0xfd   : > { %v426_v31 = vpop.f32.mrb[5].mxu0  ;;  %1554 = vmatpush3.bf16.msra.mxu1 %v489_v26  ;;  %v479_v34 = vmul.f32 %v1543_v28, %v1826_v27  ;;  %v272_v26 = vld [vmem:[%s2083_s1 + $0xc8] sm:$0xff]  ;;  %v273_v28 = vld [vmem:[%s2083_s1 + $0xd0] sm:$0xff] }
  0xfe   : > { %v1544_v33 = vpop.f32.mrb[6].mxu0  ;;  %1555 = vmatprep.subr.bf16.mxu1 %v490_v25  ;;  %v477_v37 = vmul.f32 %v426_v31, %v1836_v30  ;;  %627 = vperm.xlu1 %1692, %v270_v21   ;;  %v274_v31 = vld [vmem:[%s2083_s1 + $0xd8] sm:$0xff] }
  0xff   : > { %v480_v35 = vmul.f32 %v1544_v33, %v1831_v29  ;;  %v429_v36 = vpop.f32.mrb[7].mxu0  ;;  %803 = vrot.lane.b32.xlu0 %v1709_v8, %s1742_s23  ;;  %v275_v33 = vld [vmem:[%s2083_s1 + $0xe0] sm:$0xff] }
 0x100   : > { %v478_v38 = vmul.f32 %v429_v36, %v1841_v32  ;;  %v278_v36 = vld [vmem:[%s2083_s1 + $0xf8] sm:$0xff] }
 0x101   : > { %v492_v39 = vpack.c.bf16 %v480_v35, %v479_v34  ;;  %1556 = vmatpush3.bf16.msra.mxu1 %v490_v25  ;;  %v271_v25 = vld [vmem:[%s2083_s1 + $0xc0] sm:$0xff]  ;;  %v276_v34 = vld [vmem:[%s2083_s1 + $0xe8] sm:$0xff]  ;;  %v277_v35 = vld [vmem:[%s2083_s1 + $0xf0] sm:$0xff] }
 0x102   : > { %v491_v40 = vpack.c.bf16 %v478_v38, %v477_v37  ;;  %805 = vrot.lane.b32.xlu1 %v1710_v22, %s1742_s23 }
 0x103   : > { %807 = vrot.lane.b32.xlu0 %v1711_v23, %s1742_s23 }
 0x104   : > { %v1547_v42 = vpop.f32.mrb[8].mxu0  ;;  %1557 = vmatprep.subr.bf16.mxu1 %v491_v40 }
 0x105   : > { %v442_v45 = vpop.f32.mrb[9].mxu0  ;;  %1558 = vmatpush3.bf16.msra.mxu1 %v491_v40  ;;  %v483_v48 = vmul.f32 %v1547_v42, %v1850_v41 }
 0x106   : > { %v1548_v47 = vpop.f32.mrb[10].mxu0  ;;  %1559 = vmatprep.subr.bf16.mxu1 %v492_v39  ;;  %v481_v51 = vmul.f32 %v442_v45, %v1860_v44  ;;  %809 = vrot.lane.b32.xlu1 %v1712_v24, %s1742_s23 }
 0x107   : > { %v484_v49 = vmul.f32 %v1548_v47, %v1855_v43  ;;  %v445_v50 = vpop.f32.mrb[11].mxu0  ;;  %765 = vperm.xlu0 %1691, %v271_v25  }
 0x108   : > { %v482_v52 = vmul.f32 %v445_v50, %v1865_v46 }
 0x109   : > { %v494_v53 = vpack.c.bf16 %v484_v49, %v483_v48  ;;  %1560 = vmatpush3.bf16.msra.mxu1 %v492_v39 }
 0x10a   : > { %v493_v54 = vpack.c.bf16 %v482_v52, %v481_v51  ;;  %770 = vperm.xlu1 %1692, %v272_v26  }
 0x10b   : > { %775 = vperm.xlu0 %1691, %v273_v28  }
 0x10c   : > { %v1551_v56 = vpop.f32.mrb[12].mxu0  ;;  %1561 = vmatprep.subr.bf16.mxu1 %v493_v54 }
 0x10d   : > { %v458_v59 = vpop.f32.mrb[13].mxu0  ;;  %1562 = vmatpush3.bf16.msra.mxu1 %v493_v54  ;;  %v487_v62 = vmul.f32 %v1551_v56, %v1874_v55 }
 0x10e   : > { %v1552_v61 = vpop.f32.mrb[14].mxu0  ;;  %1563 = vmatprep.subr.bf16.mxu1 %v494_v53  ;;  %v485_v1 = vmul.f32 %v458_v59, %v1884_v58  ;;  %780 = vperm.xlu1 %1692, %v274_v31  }
 0x10f   : > { %v488_v63 = vmul.f32 %v1552_v61, %v1879_v57  ;;  %v461_v0 = vpop.f32.mrb[15].mxu0  ;;  %785 = vperm.xlu0 %1691, %v275_v33  }
 0x110   : > { %v486_v2 = vmul.f32 %v461_v0, %v1889_v60  ;;  %v1715_v0 = vld [vmem:[%s1776_s18 + $0x50] sm:$0xff]  }
 0x111   : > { %v496_v3 = vpack.c.bf16 %v488_v63, %v487_v62  ;;  %1564 = vmatpush3.bf16.msra.mxu1 %v494_v53  ;;  %v593_v53 = vpop.permute.xlu0 %592  ;;  %v1713_v62 = vld [vmem:[%s1776_s18 + $0x40] sm:$0xff]   ;;  %v1714_v63 = vld [vmem:[%s1776_s18 + $0x48] sm:$0xff]  }
 0x112   : > { %v495_v4 = vpack.c.bf16 %v486_v2, %v485_v1  ;;  %790 = vperm.xlu1 %1692, %v276_v34   ;;  %v1716_v1 = vld [vmem:[%s1776_s18 + $0x58] sm:$0xff]   ;;  %v1717_v2 = vld [vmem:[%s1776_s18 + $0x60] sm:$0xff]  }
 0x113   : > { %795 = vperm.xlu0 %1691, %v277_v35  }
 0x114   : > { %1565 = vmatprep.subr.bf16.mxu1 %v495_v4 }
 0x115   : > { %1566 = vmatpush3.bf16.msra.mxu1 %v495_v4  ;;  %v598_v54 = vpop.permute.xlu0 %597 }
 0x116   : > { %1567 = vmatprep.subr.bf16.mxu1 %v496_v3  ;;  %800 = vperm.xlu1 %1692, %v278_v36  }
 0x119   : > { %1568 = vmatpush3.bf16.msra.mxu1 %v496_v3  ;;  %v603_v3 = vpop.permute.xlu1 %602 }
 0x11c   : > { %1570 = vmatmul.mubr.bf16.vlgmr.msra.gmra.mrb[0].mxu1 %v1706_v5 }
 0x11d   : > { %1573 = vmatprep.mubr.bf16.mxu1 %v1707_v6 }
 0x124   : > { %1574 = vmatmul.mubr.bf16.gmra.mrb[4].mxu1 %v1708_v7 }
 0x175   : > { %v608_v4 = vpop.permute.xlu1 %607 }
 0x176   : > { %v613_v56 = vpop.permute.xlu0 %612 }
 0x179   : > { %v618_v14 = vpop.permute.xlu1 %617 }
 0x17a   : > { %v623_v59 = vpop.permute.xlu0 %622 }
 0x17e   : > { %v804_v61 = vpop.permute.xlu0 %803 }
 0x17f   : > { %1601 = vmatprep.mubr.msk.bf16.mxu1 %vm351_vm0, %v804_v61 }
 0x1ef   : > { %v1959_v37 = vpop.f32.mrb[0].mxu1 }
 0x1f0   : > { %v1961_v38 = vpop.f32.mrb[1].mxu1 }
 0x1f1   : > { %v1963_v39 = vpop.f32.mrb[2].mxu1 }
 0x1f2   : > { %v587_v40 = vpack.c.bf16 %v1963_v39, %v1959_v37  ;;  %v1967_v42 = vpop.f32.mrb[3].mxu1 }
 0x1f3   : > { %v586_v45 = vpack.c.bf16 %v1967_v42, %v1961_v38 }
 0x1f5   : > { %1577 = vmatprep.subr.bf16.mxu0 %v586_v45 }
 0x1f6   : > { %1578 = vmatpush3.bf16.msra.mxu0 %v586_v45 }
 0x1f7   : > { %v1971_v47 = vpop.f32.mrb[4].mxu1  ;;  %1579 = vmatprep.subr.bf16.mxu0 %v587_v40 }
 0x1f8   : > { %v1973_v48 = vpop.f32.mrb[5].mxu1 }
 0x1f9   : > { %v1975_v49 = vpop.f32.mrb[6].mxu1 }
 0x1fa   : > { %v589_v50 = vpack.c.bf16 %v1975_v49, %v1971_v47  ;;  %v1979_v51 = vpop.f32.mrb[7].mxu1  ;;  %1580 = vmatpush3.bf16.msra.mxu0 %v587_v40  ;;  %v628_v40 = vpop.permute.xlu1 %627 }
 0x1fb   : > { %v588_v52 = vpack.c.bf16 %v1979_v51, %v1973_v48 }
 0x1fd   : > { %1581 = vmatprep.subr.bf16.mxu0 %v588_v52 }
 0x1fe   : > { %1582 = vmatpush3.bf16.msra.mxu0 %v588_v52 }
 0x1ff   : > { %1583 = vmatprep.subr.bf16.mxu0 %v589_v50 }
 0x202   : > { %1584 = vmatpush3.bf16.msra.mxu0 %v589_v50 }
 0x203   : > { %1609 = vmatprep.subr.bf16.mxu0 %v1713_v62 }
 0x205   : > { %1586 = vmatmul.mubr.msk.bf16.vlgmr.msra.gmra.mrb[16].mxu0 %vm351_vm0, %v1710_v22 }
 0x206   : > { %1589 = vmatprep.mubr.msk.bf16.mxu0 %vm351_vm0, %v1711_v23  ;;  %1610 = vmatpush3.bf16.msra.mxu0 %v1713_v62 }
 0x207   : > { %1611 = vmatprep.subr.bf16.mxu0 %v1714_v63 }
 0x20a   : > { %1612 = vmatpush3.bf16.msra.mxu0 %v1714_v63 }
 0x20b   : > { %1613 = vmatprep.subr.bf16.mxu0 %v1715_v0 }
 0x20d   : > { %1590 = vmatmul.mubr.msk.bf16.gmra.mrb[20].mxu0 %vm351_vm0, %v1712_v24 }
 0x20e   : > { %1614 = vmatpush3.bf16.msra.mxu0 %v1715_v0 }
 0x20f   : > { %1615 = vmatprep.subr.bf16.mxu0 %v1716_v1 }
 0x212   : > { %1616 = vmatpush3.bf16.msra.mxu0 %v1716_v1 }
 0x213   : > { %1617 = vmatprep.subr.bf16.mxu0 %v1717_v2 }
 0x216   : > { %1618 = vmatpush3.bf16.msra.mxu0 %v1717_v2 }
 0x2d8   : > { %v1587_v5 = vpop.f32.mrb[16].mxu0 }
 0x2d9   : > { %v705_v6 = vadd.f32 %v1587_v5, %v603_v3  ;;  %v696_v7 = vpop.f32.mrb[17].mxu0 }
 0x2da   : > { %v697_v8 = vadd.f32 %v696_v7, %v593_v53  ;;  %v1588_v9 = vpop.f32.mrb[18].mxu0  ;;  %v1719_v7 = vld [vmem:[%s1776_s18 + $0x70] sm:$0xff]  }
 0x2db   : > { %vm729_vm1 = vcmp.gt.f32.partialorder %v705_v6, 0.0  ;;  %v737_v10 = vmul.f32 0.5, %v705_v6  ;;  %v708_v11 = vadd.f32 %v1588_v9, %v608_v4  ;;  %v699_v12 = vpop.f32.mrb[19].mxu0 }
 0x2dc   : > { %vm727_vm2 = vcmp.gt.f32.partialorder %v697_v8, 0.0  ;;  %v735_v17 = vmul.f32 0.5, %v697_v8  ;;  %v700_v19 = vadd.f32 %v699_v12, %v598_v54 }
 0x2dd   : > { %v745_v20 = vsel %vm729_vm1, %v705_v6, %v737_v10  ;;  %vm730_vm3 = vcmp.gt.f32.partialorder %v708_v11, 0.0  ;;  %v738_v21 = vmul.f32 0.5, %v708_v11  ;;  %v808_v6 = vpop.permute.xlu0 %807 }
 0x2de   : > { %v743_v22 = vsel %vm727_vm2, %v697_v8, %v735_v17  ;;  %vm728_vm4 = vcmp.gt.f32.partialorder %v700_v19, 0.0  ;;  %v736_v23 = vmul.f32 0.5, %v700_v19  ;;  %v1993_v24 = vadd.f32 %v1959_v37, %v745_v20  ;;  %v1720_v8 = vld [vmem:[%s1776_s18 + $0x78] sm:$0xff]  }
 0x2df   : > { %v746_v25 = vsel %vm730_vm3, %v708_v11, %v738_v21  ;;  %v1996_v26 = vadd.f32 %v743_v22, %v1961_v38 }
 0x2e0   : > { %v744_v28 = vsel %vm728_vm4, %v700_v19, %v736_v23  ;;  %v1591_v31 = vpop.f32.mrb[20].mxu0  ;;  %v1999_v33 = vadd.f32 %v1963_v39, %v746_v25 }
 0x2e1   : > { %v721_v34 = vadd.f32 %v1591_v31, %v623_v59  ;;  %v712_v35 = vpop.f32.mrb[21].mxu0  ;;  %v2002_v36 = vadd.f32 %v744_v28, %v1967_v42  ;;  %v766_v9 = vpop.permute.xlu0 %765 }
 0x2e2   : > { %v713_v45 = vadd.f32 %v712_v35, %v613_v56  ;;  %v1592_v50 = vpop.f32.mrb[22].mxu0  ;;  %v760_v42 = vpack.c.bf16 %v1999_v33, %v1993_v24 }
 0x2e3   : > { %vm733_vm5 = vcmp.gt.f32.partialorder %v721_v34, 0.0  ;;  %v741_v37 = vmul.f32 0.5, %v721_v34  ;;  %v724_v52 = vadd.f32 %v1592_v50, %v628_v40  ;;  %v715_v53 = vpop.f32.mrb[23].mxu0  ;;  %v759_v38 = vpack.c.bf16 %v2002_v36, %v1996_v26 }
 0x2e4   : > { %vm731_vm6 = vcmp.gt.f32.partialorder %v713_v45, 0.0  ;;  %v739_v54 = vmul.f32 0.5, %v713_v45  ;;  %v716_v61 = vadd.f32 %v715_v53, %v618_v14 }
 0x2e5   : > { %v749_v39 = vsel %vm733_vm5, %v721_v34, %v741_v37  ;;  %vm734_vm7 = vcmp.gt.f32.partialorder %v724_v52, 0.0  ;;  %v742_v59 = vmul.f32 0.5, %v724_v52  ;;  %1593 = vmatprep.subr.bf16.mxu1 %v759_v38  ;;  %v776_v11 = vpop.permute.xlu0 %775 }
 0x2e6   : > { %v747_v62 = vsel %vm731_vm6, %v713_v45, %v739_v54  ;;  %vm732_vm8 = vcmp.gt.f32.partialorder %v716_v61, 0.0  ;;  %v740_v56 = vmul.f32 0.5, %v716_v61  ;;  %1594 = vmatpush3.bf16.msra.mxu1 %v759_v38  ;;  %v2009_v63 = vadd.f32 %v1971_v47, %v749_v39 }
 0x2e7   : > { %v750_v0 = vsel %vm734_vm7, %v724_v52, %v742_v59  ;;  %1595 = vmatprep.subr.bf16.mxu1 %v760_v42  ;;  %v2012_v1 = vadd.f32 %v747_v62, %v1973_v48  ;;  %v806_v48 = vpop.permute.xlu1 %805 }
 0x2e8   : > { %v748_v2 = vsel %vm732_vm8, %v716_v61, %v740_v56  ;;  %v2015_v3 = vadd.f32 %v1975_v49, %v750_v0 }
 0x2e9   : > { %v2018_v4 = vadd.f32 %v748_v2, %v1979_v51  ;;  %v1718_v51 = vld [vmem:[%s1776_s18 + $0x68] sm:$0xff]   ;;  %v786_v20 = vpop.permute.xlu0 %785 }
 0x2ea   : > { %1596 = vmatpush3.bf16.msra.mxu1 %v760_v42  ;;  %v762_v47 = vpack.c.bf16 %v2015_v3, %v2009_v63  ;;  %1619 = vmatprep.subr.bf16.mxu0 %v1718_v51 }
 0x2eb   : > { %v761_v5 = vpack.c.bf16 %v2018_v4, %v2012_v1  ;;  %v810_v49 = vpop.permute.xlu1 %809  ;;  %1620 = vmatpush3.bf16.msra.mxu0 %v1718_v51 }
 0x2ec   : > { %1621 = vmatprep.subr.bf16.mxu0 %v1719_v7 }
 0x2ed   : > { %1597 = vmatprep.subr.bf16.mxu1 %v761_v5  ;;  %v796_v53 = vpop.permute.xlu0 %795 }
 0x2ee   : > { %1598 = vmatpush3.bf16.msra.mxu1 %v761_v5 }
 0x2ef   : > { %1599 = vmatprep.subr.bf16.mxu1 %v762_v47  ;;  %1622 = vmatpush3.bf16.msra.mxu0 %v1719_v7  ;;  %v771_v10 = vpop.permute.xlu1 %770 }
 0x2f0   : > { %1623 = vmatprep.subr.bf16.mxu0 %v1720_v8 }
 0x2f2   : > { %1600 = vmatpush3.bf16.msra.mxu1 %v762_v47 }
 0x2f3   : > { %1624 = vmatpush3.bf16.msra.mxu0 %v1720_v8  ;;  %v781_v12 = vpop.permute.xlu1 %780 }
 0x2f5   : > { %1602 = vmatmul.mubr.msk.bf16.vlgmr.msra.gmra.mrb[8].mxu1 %vm351_vm0, %v806_v48 }
 0x2f6   : > { %1605 = vmatprep.mubr.msk.bf16.mxu1 %vm351_vm0, %v808_v6 }
 0x2f7   : > { %v791_v31 = vpop.permute.xlu1 %790 }
 0x2fb   : > { %v801_v0 = vpop.permute.xlu1 %800 }
 0x2fd   : > { %1606 = vmatmul.mubr.msk.bf16.gmra.mrb[12].mxu1 %vm351_vm0, %v810_v49 }
 0x3c8   : > { %v1603_v14 = vpop.f32.mrb[8].mxu1 }
 0x3c9   : > { %v866_v17 = vadd.f32 %v1603_v14, %v776_v11  ;;  %v857_v19 = vpop.f32.mrb[9].mxu1 }
 0x3ca   : > { %v858_v21 = vadd.f32 %v857_v19, %v766_v9  ;;  %v1604_v22 = vpop.f32.mrb[10].mxu1 }
 0x3cb   : > { %vm890_vm9 = vcmp.gt.f32.partialorder %v866_v17, 0.0  ;;  %v898_v23 = vmul.f32 0.5, %v866_v17  ;;  %v869_v25 = vadd.f32 %v1604_v22, %v781_v12  ;;  %v860_v28 = vpop.f32.mrb[11].mxu1 }
 0x3cc   : > { %vm888_vm10 = vcmp.gt.f32.partialorder %v858_v21, 0.0  ;;  %v896_v34 = vmul.f32 0.5, %v858_v21  ;;  %v861_v35 = vadd.f32 %v860_v28, %v771_v10 }
 0x3cd   : > { %v906_v40 = vsel %vm890_vm9, %v866_v17, %v898_v23  ;;  %vm891_vm11 = vcmp.gt.f32.partialorder %v869_v25, 0.0  ;;  %v899_v45 = vmul.f32 0.5, %v869_v25 }
 0x3ce   : > { %v904_v50 = vsel %vm888_vm10, %v858_v21, %v896_v34  ;;  %vm889_vm12 = vcmp.gt.f32.partialorder %v861_v35, 0.0  ;;  %v897_v37 = vmul.f32 0.5, %v861_v35  ;;  %v914_v38 = vadd.f32 %v906_v40, %v1993_v24  ;;  %v1721_v21 = vld [vmem:[%s1776_s18 + $0xc0] sm:$0xff]  }
 0x3cf   : > { %v907_v52 = vsel %vm891_vm11, %v869_v25, %v899_v45  ;;  %v912_v62 = vadd.f32 %v904_v50, %v1996_v26  ;;  %1641 = vmatprep.mubr.msk.bf16.mxu1 %vm351_vm0, %v1721_v21  ;;  %v1722_v45 = vld [vmem:[%s1776_s18 + $0xc8] sm:$0xff]   ;;  %v1723_v50 = vld [vmem:[%s1776_s18 + $0xd0] sm:$0xff]  }
 0x3d0   : > { %v915_v54 = vadd.f32 %v907_v52, %v1999_v33  ;;  %v905_v61 = vsel %vm889_vm12, %v861_v35, %v897_v37  ;;  %v1607_v39 = vpop.f32.mrb[12].mxu1  ;;  %v1724_v37 = vld [vmem:[%s1776_s18 + $0xd8] sm:$0xff]   ;;  %v1725_v52 = vld [vmem:[%s1776_s18 + $0xe0] sm:$0xff]  }
 0x3d1   : > { %v882_v59 = vadd.f32 %v1607_v39, %v796_v53  ;;  %v873_v42 = vpop.f32.mrb[13].mxu1  ;;  %v913_v56 = vadd.f32 %v905_v61, %v2002_v36  ;;  %v1726_v53 = vld [vmem:[%s1776_s18 + $0xe8] sm:$0xff]   ;;  %v1729_v61 = vld [vmem:[%s1776_s18 + $0x20] sm:$0xff]  }
 0x3d2   : > { %v921_v2 = vpack.c.bf16 %v915_v54, %v914_v38  ;;  %v874_v5 = vadd.f32 %v873_v42, %v786_v20  ;;  %v1608_v47 = vpop.f32.mrb[14].mxu1  ;;  %v1727_v38 = vld [vmem:[%s1776_s18 + $0xf0] sm:$0xff]   ;;  %v1728_v54 = vld [vmem:[%s1776_s18 + $0xf8] sm:$0xff]  }
 0x3d3   : > { %vm894_vm13 = vcmp.gt.f32.partialorder %v882_v59, 0.0  ;;  %v902_v48 = vmul.f32 0.5, %v882_v59  ;;  %v885_v6 = vadd.f32 %v1608_v47, %v801_v0  ;;  %v876_v49 = vpop.f32.mrb[15].mxu1  ;;  %v920_v51 = vpack.c.bf16 %v913_v56, %v912_v62 }
 0x3d4   : > { %vm892_vm14 = vcmp.gt.f32.partialorder %v874_v5, 0.0  ;;  %v900_v24 = vmul.f32 0.5, %v874_v5  ;;  %v877_v33 = vadd.f32 %v876_v49, %v791_v31 }
 0x3d5   : > { %v910_v7 = vsel %vm894_vm13, %v882_v59, %v902_v48  ;;  %vm895_vm15 = vcmp.gt.f32.partialorder %v885_v6, 0.0  ;;  %v903_v8 = vmul.f32 0.5, %v885_v6  ;;  %1625 = vmatprep.mubr.bf16.mxu0 %v920_v51 }
 0x3d6   : > { %v908_v26 = vsel %vm892_vm14, %v874_v5, %v900_v24  ;;  %vm893_vm1 = vcmp.gt.f32.partialorder %v877_v33, 0.0  ;;  %v901_v36 = vmul.f32 0.5, %v877_v33  ;;  %1626 = vmatmul.mubr.bf16.vlgmr.msra.gmra.mrb[24].mxu0 %v921_v2  ;;  %v918_v11 = vadd.f32 %v910_v7, %v2009_v63 }
 0x3d7   : > { %v911_v9 = vsel %vm895_vm15, %v885_v6, %v903_v8  ;;  %v916_v14 = vadd.f32 %v908_v26, %v2012_v1 }
 0x3d8   : > { %v909_v10 = vsel %vm893_vm1, %v877_v33, %v901_v36  ;;  %v919_v12 = vadd.f32 %v911_v9, %v2015_v3 }
 0x3d9   : > { %v917_v17 = vadd.f32 %v909_v10, %v2018_v4 }
 0x3da   : > { %v923_v19 = vpack.c.bf16 %v919_v12, %v918_v11 }
 0x3db   : > { %v922_v20 = vpack.c.bf16 %v917_v17, %v916_v14 }
 0x3dd   : > { %1629 = vmatprep.mubr.bf16.mxu0 %v922_v20 }
 0x3de   : > { %1630 = vmatmul.mubr.bf16.gmra.mrb[28].mxu0 %v923_v19 }
 0x4a9   : > { %v1627_v22 = vpop.f32.mrb[24].mxu0 }
 0x4aa   : > { %v1006_v23 = vpop.f32.mrb[25].mxu0 }
 0x4ab   : > { %v1628_v25 = vpop.f32.mrb[26].mxu0 }
 0x4ac   : > { %v1038_v28 = vpack.c.bf16 %v1628_v25, %v1627_v22  ;;  %v1009_v31 = vpop.f32.mrb[27].mxu0  ;;  %v1730_v22 = vld [vmem:[%s1776_s18 + $0x28] sm:$0xff]  }
 0x4ad   : > { %v1037_v63 = vpack.c.bf16 %v1009_v31, %v1006_v23  ;;  %v1731_v23 = vld [vmem:[%s1776_s18 + $0x30] sm:$0xff]  }
 0x4af   : > { %1633 = vmatprep.subr.bf16.mxu1 %v1037_v63 }
 0x4b0   : > { %1634 = vmatpush3.bf16.msra.mxu1 %v1037_v63 }
 0x4b1   : > { %v1631_v1 = vpop.f32.mrb[28].mxu0  ;;  %1635 = vmatprep.subr.bf16.mxu1 %v1038_v28 }
 0x4b2   : > { %v1022_v3 = vpop.f32.mrb[29].mxu0 }
 0x4b3   : > { %v1632_v4 = vpop.f32.mrb[30].mxu0 }
 0x4b4   : > { %v1040_v34 = vpack.c.bf16 %v1632_v4, %v1631_v1  ;;  %v1025_v35 = vpop.f32.mrb[31].mxu0  ;;  %1636 = vmatpush3.bf16.msra.mxu1 %v1038_v28 }
 0x4b5   : > { %v1039_v40 = vpack.c.bf16 %v1025_v35, %v1022_v3 }
 0x4b7   : > { %1637 = vmatprep.subr.bf16.mxu1 %v1039_v40 }
 0x4b8   : > { %1638 = vmatpush3.bf16.msra.mxu1 %v1039_v40 }
 0x4b9   : > { %1639 = vmatprep.subr.bf16.mxu1 %v1040_v34 }
 0x4bc   : > { %1640 = vmatpush3.bf16.msra.mxu1 %v1040_v34 }
 0x4bf   : > { %1642 = vmatmul.mubr.msk.bf16.vlgmr.msra.gmra.mrb[16].mxu1 %vm351_vm0, %v1722_v45 }
 0x4c0   : > { %1645 = vmatprep.mubr.msk.bf16.mxu1 %vm351_vm0, %v1723_v50 }
 0x4c7   : > { %1646 = vmatmul.mubr.msk.bf16.gmra.mrb[20].mxu1 %vm351_vm0, %v1724_v37 }
 0x4c8   : > { %1649 = vmatprep.mubr.msk.bf16.mxu1 %vm351_vm0, %v1725_v52 }
 0x4cf   : > { %1650 = vmatmul.mubr.msk.bf16.gmra.mrb[24].mxu1 %vm351_vm0, %v1726_v53 }
 0x4d0   : > { %1653 = vmatprep.mubr.msk.bf16.mxu1 %vm351_vm0, %v1727_v38 }
 0x4d7   : > { %1654 = vmatmul.mubr.msk.bf16.gmra.mrb[28].mxu1 %vm351_vm0, %v1728_v54 }
 0x4d8   : > { %1673 = vmatprep.mubr.bf16.mxu1 %v1729_v61 }
 0x592   : > { %v1643_v39 = vpop.f32.mrb[16].mxu1 }
 0x593   : > { %v1139_v59 = vpop.f32.mrb[17].mxu1  ;;  %v1204_v62 = vmul.f32 %v1643_v39, %v1802_v13 }
 0x594   : > { %v1644_v42 = vpop.f32.mrb[18].mxu1  ;;  %v1202_v2 = vmul.f32 %v1139_v59, %v1812_v16 }
 0x595   : > { %v1205_v56 = vmul.f32 %v1644_v42, %v1807_v15  ;;  %v1142_v0 = vpop.f32.mrb[19].mxu1 }
 0x596   : > { %v1203_v5 = vmul.f32 %v1142_v0, %v1817_v18 }
 0x597   : > { %v1219_v47 = vpack.c.bf16 %v1205_v56, %v1204_v62 }
 0x598   : > { %v1218_v48 = vpack.c.bf16 %v1203_v5, %v1202_v2 }
 0x59a   : > { %v1647_v6 = vpop.f32.mrb[20].mxu1  ;;  %1657 = vmatprep.subr.bf16.mxu1 %v1218_v48 }
 0x59b   : > { %v1155_v49 = vpop.f32.mrb[21].mxu1  ;;  %1658 = vmatpush3.bf16.msra.mxu1 %v1218_v48  ;;  %v1208_v24 = vmul.f32 %v1647_v6, %v1826_v27 }
 0x59c   : > { %v1648_v51 = vpop.f32.mrb[22].mxu1  ;;  %1659 = vmatprep.subr.bf16.mxu1 %v1219_v47  ;;  %v1206_v15 = vmul.f32 %v1155_v49, %v1836_v30 }
 0x59d   : > { %v1209_v33 = vmul.f32 %v1648_v51, %v1831_v29  ;;  %v1158_v13 = vpop.f32.mrb[23].mxu1 }
 0x59e   : > { %v1207_v7 = vmul.f32 %v1158_v13, %v1841_v32 }
 0x59f   : > { %v1221_v16 = vpack.c.bf16 %v1209_v33, %v1208_v24  ;;  %1660 = vmatpush3.bf16.msra.mxu1 %v1219_v47 }
 0x5a0   : > { %v1220_v18 = vpack.c.bf16 %v1207_v7, %v1206_v15 }
 0x5a2   : > { %v1651_v8 = vpop.f32.mrb[24].mxu1  ;;  %1661 = vmatprep.subr.bf16.mxu1 %v1220_v18 }
 0x5a3   : > { %v1171_v26 = vpop.f32.mrb[25].mxu1  ;;  %1662 = vmatpush3.bf16.msra.mxu1 %v1220_v18  ;;  %v1212_v9 = vmul.f32 %v1651_v8, %v1850_v41 }
 0x5a4   : > { %v1652_v36 = vpop.f32.mrb[26].mxu1  ;;  %1663 = vmatprep.subr.bf16.mxu1 %v1221_v16  ;;  %v1210_v29 = vmul.f32 %v1171_v26, %v1860_v44 }
 0x5a5   : > { %v1213_v27 = vmul.f32 %v1652_v36, %v1855_v43  ;;  %v1174_v10 = vpop.f32.mrb[27].mxu1 }
 0x5a6   : > { %v1211_v30 = vmul.f32 %v1174_v10, %v1865_v46 }
 0x5a7   : > { %v1223_v11 = vpack.c.bf16 %v1213_v27, %v1212_v9  ;;  %1664 = vmatpush3.bf16.msra.mxu1 %v1221_v16 }
 0x5a8   : > { %v1222_v32 = vpack.c.bf16 %v1211_v30, %v1210_v29 }
 0x5aa   : > { %v1655_v12 = vpop.f32.mrb[28].mxu1  ;;  %1665 = vmatprep.subr.bf16.mxu1 %v1222_v32 }
 0x5ab   : > { %v1187_v14 = vpop.f32.mrb[29].mxu1  ;;  %1666 = vmatpush3.bf16.msra.mxu1 %v1222_v32  ;;  %v1216_v41 = vmul.f32 %v1655_v12, %v1874_v55  ;;  %v1732_v55 = vld [vmem:[%s1776_s18 + $0x38] sm:$0xff]  }
 0x5ac   : > { %v1656_v17 = vpop.f32.mrb[30].mxu1  ;;  %1667 = vmatprep.subr.bf16.mxu1 %v1223_v11  ;;  %v1214_v44 = vmul.f32 %v1187_v14, %v1884_v58 }
 0x5ad   : > { %v1217_v43 = vmul.f32 %v1656_v17, %v1879_v57  ;;  %v1190_v19 = vpop.f32.mrb[31].mxu1 }
 0x5ae   : > { %v1215_v46 = vmul.f32 %v1190_v19, %v1889_v60 }
 0x5af   : > { %v1225_v20 = vpack.c.bf16 %v1217_v43, %v1216_v41  ;;  %1668 = vmatpush3.bf16.msra.mxu1 %v1223_v11 }
 0x5b0   : > { %v1224_v21 = vpack.c.bf16 %v1215_v46, %v1214_v44 }
 0x5b2   : > { %1669 = vmatprep.subr.bf16.mxu1 %v1224_v21 }
 0x5b3   : > { %1670 = vmatpush3.bf16.msra.mxu1 %v1224_v21 }
 0x5b4   : > { %1671 = vmatprep.subr.bf16.mxu1 %v1225_v20 }
 0x5b7   : > { %1672 = vmatpush3.bf16.msra.mxu1 %v1225_v20 }
 0x5ba   : > { %1674 = vmatmul.mubr.bf16.vlgmr.msra.gmra.mrb[32].mxu1 %v1730_v22 }
 0x5bb   : > { %1677 = vmatprep.mubr.bf16.mxu1 %v1731_v23 }
 0x5c2   : > { %1678 = vmatmul.mubr.bf16.gmra.mrb[36].mxu1 %v1732_v55 }
 0x68d   : > { %v1675_v57 = vpop.f32.mrb[32].mxu1 }
 0x68e   : > { %1317 = vst [vmem:[%s172_s24 + $0x10] sm:$0xff] %v1675_v57  ;;  %v1284_v58 = vpop.f32.mrb[33].mxu1 }
 0x68f   : > { %1315 = vst [vmem:[%s172_s24] sm:$0xff] %v1284_v58  ;;  %v1676_v60 = vpop.f32.mrb[34].mxu1 }
 0x690   : > { %1318 = vst [vmem:[%s172_s24 + $0x18] sm:$0xff] %v1676_v60  ;;  %v1287_v25 = vpop.f32.mrb[35].mxu1 }
 0x691   : > { %1316 = vst [vmem:[%s172_s24 + $0x8] sm:$0xff] %v1287_v25 }
 0x695   : > { %v1679_v28 = vpop.f32.mrb[36].mxu1 }
 0x696   : > { %1321 = vst [vmem:[%s172_s24 + $0x30] sm:$0xff] %v1679_v28  ;;  %v1300_v31 = vpop.f32.mrb[37].mxu1 }
 0x697   : > { %1319 = vst [vmem:[%s172_s24 + $0x20] sm:$0xff] %v1300_v31  ;;  %v1680_v63 = vpop.f32.mrb[38].mxu1 }
 0x698   : > { %1322 = vst [vmem:[%s172_s24 + $0x38] sm:$0xff] %v1680_v63  ;;  %v1303_v1 = vpop.f32.mrb[39].mxu1 }
 0x699   : > { %1320 = vst [vmem:[%s172_s24 + $0x28] sm:$0xff] %v1303_v1 }
 0x69a PF: > { %s13_s12 = sadd.s32 1, %s1739_s12  }
 0x69b   : > { %p10_p5 = scmp.ge.s32.totalorder %s13_s12, 4  }
 0x69d   :  { %12 = sbr.rel (!%p10_p5) target bundleno = 1 (0x1), region = 62 }

</bundles_post_ra>
